<compile_context>
chip_gen: v7x
topology: tpu7x:2x2x1
jax: 0.10.0
libtpu: 0.0.40
codegen_flags: <defaults>
</compile_context>

<pallas_src>
import functools

import jax
import jax.numpy as jnp
from jax import lax
from jax.experimental import pallas as pl
from jax.experimental.pallas import tpu as pltpu

# Small synthetic sizes (module defaults are channels=224, window=16).
CHANNELS = 32
WINDOW = 16
SEQ = 48
BETA = 0.95      # snn.Leaky(beta=0.95)
THRESH = 1.0     # snn.Leaky(threshold=1), reset_mechanism="subtract"
GROUP = 8        # timesteps per unrolled group (one sublane group)


def _sliding_window_sum(y, window, out_len):
    """sum of `window` consecutive rows of y, vectorized over all start indices."""
    if window & (window - 1) == 0:
        # power-of-two window: log2(window) shifted adds (prefix doubling)
        acc, span = y, 1
        while span < window:
            n = acc.shape[0]
            acc = acc[0:n - span, :] + acc[span:n, :]
            span *= 2
        return acc[0:out_len, :]
    # generic fallback: window-1 shifted adds
    acc = y[0:out_len, :]
    for k in range(1, window):
        acc = acc + y[k:k + out_len, :]
    return acc


def _harmolearn_kernel(inp_ref, out_ref, cc_ref, *, window, c_real, group):
    # Layout: (T_pad, C_pad) time-major; channels on the 128-lane axis.
    T, Cp = inp_ref.shape
    Tm = T - window                                          # padded serial length

    # ---- passthrough of the first `window` timesteps (out = deepcopy(inp)) ----
    out_ref[0:window, :] = inp_ref[0:window, :]

    # ---- phase 1: hoisted, fully vectorized cc computation --------------------
    x_all = inp_ref[...]                                     # (T, Cp)
    row_sum = jnp.sum(x_all, axis=1, keepdims=True)          # (T, 1)   XLU lane reduce
    y = x_all * row_sum                                      # (T, Cp)  VPU

    # cc_raw[i, c] = sum_{k<window} y[i+k, c]  ==  (B @ B.T).sum(-1) at t = i+window
    cc_raw = _sliding_window_sum(y, window, Tm)              # (Tm, Cp)

    # Per-timestep max over the *real* channels only (padded lanes masked out;
    # padded lanes hold 0 which can never exceed the real max, but mask anyway).
    lane = lax.broadcasted_iota(jnp.int32, (Tm, Cp), 1)
    neg = jnp.finfo(jnp.float32).min
    cc_max = jnp.max(jnp.where(lane < c_real, cc_raw, neg), axis=1, keepdims=True)
    cc_norm = cc_raw * pl.reciprocal(1e-05 + cc_max, approx=False)
    cc_ref[...] = cc_norm                                    # (Tm, Cp) VMEM scratch

    # ---- phase 2: only the true recurrences stay serial -----------------------
    n_groups = Tm // group

    def group_body(g, carry):
        w, mem = carry
        base = pl.multiple_of(g * group, group)
        cc_blk = cc_ref[pl.ds(base, group), :]               # (group, Cp) dense load
        x_blk = inp_ref[pl.ds(window + base, group), :]      # (group, Cp) dense load
        spk_rows = []
        for k in range(group):                               # unrolled: LLO can overlap
            w = 0.5 * w + 0.5 * cc_blk[k:k + 1, :]           # w EWMA (unclipped w drives neuron)
            cur = w * x_blk[k:k + 1, :]
            reset = (mem > THRESH).astype(jnp.float32)
            mem = BETA * mem + cur - reset * THRESH          # reset-by-subtraction
            spk_rows.append((mem > THRESH).astype(jnp.float32))
        # One dense (group, Cp) store instead of `group` masked 1-row stores.
        out_ref[pl.ds(window + base, group), :] = jnp.concatenate(spk_rows, axis=0)
        return (w, mem)

    w0 = jnp.ones((1, Cp), jnp.float32)                      # self.w = np.ones(channels)
    mem0 = jnp.zeros((1, Cp), jnp.float32)                   # sleaky.init_leaky()
    lax.fori_loop(0, n_groups, group_body, (w0, mem0))


def harmolearn_forward(inp_ct, window=WINDOW):
    """inp_ct: (channels, T) float32, matching the PyTorch module's axis convention."""
    C, T = inp_ct.shape
    assert T > window, "need at least one timestep past the window"

    # Pad channels to a lane-dense multiple of 128 (zeros; masked out of the max)
    # and pad time so the serial region is a whole number of GROUP-sized blocks
    # (padded timesteps computed then discarded by the final slice).
    Cp = ((C + 127) // 128) * 128
    Tm_pad = pl.cdiv(T - window, GROUP) * GROUP
    Tp = window + Tm_pad
    inp_tc = jnp.pad(inp_ct.T.astype(jnp.float32), ((0, Tp - T), (0, Cp - C)))

    kernel = functools.partial(_harmolearn_kernel, window=window, c_real=C, group=GROUP)
    out_tc = pl.pallas_call(
        kernel,
        out_shape=jax.ShapeDtypeStruct((Tp, Cp), jnp.float32),
        grid=(1,),
        in_specs=[pl.BlockSpec((Tp, Cp), lambda i: (0, 0))],
        out_specs=pl.BlockSpec((Tp, Cp), lambda i: (0, 0)),
        scratch_shapes=[pltpu.VMEM((Tm_pad, Cp), jnp.float32)],  # cc_norm
        compiler_params=pltpu.CompilerParams(dimension_semantics=("arbitrary",)),
    )(inp_tc)
    return out_tc[:T, :C].T


def harmolearn_ref(inp_ct):
    """Pure-JAX reference of the same forward pass (for verification)."""
    C, T = inp_ct.shape

    def step(carry, t):
        w, mem = carry
        B = lax.dynamic_slice(inp_ct, (0, t - WINDOW), (C, WINDOW))   # (C, window)
        cc_mat = jnp.dot(B, B.T, precision=lax.Precision.HIGHEST)
        cc_vec = jnp.sum(cc_mat, axis=-1)
        cc_vec = cc_vec / (1e-05 + jnp.max(cc_vec))
        w = 0.5 * w + 0.5 * cc_vec
        x = lax.dynamic_slice(inp_ct, (0, t), (C, 1))[:, 0]
        cur = w * x
        reset = (mem > THRESH).astype(jnp.float32)
        mem = BETA * mem + cur - reset * THRESH
        spk = (mem > THRESH).astype(jnp.float32)
        return (w, mem), spk

    init = (jnp.ones((C,), jnp.float32), jnp.zeros((C,), jnp.float32))
    _, spks = lax.scan(step, init, jnp.arange(WINDOW, T))
    return jnp.concatenate([inp_ct[:, :WINDOW], spks.T], axis=1)


if __name__ == "__main__":
    key = jax.random.PRNGKey(0)
    inp = jax.random.normal(key, (CHANNELS, SEQ), dtype=jnp.float32)

    out = jax.block_until_ready(harmolearn_forward(inp))
    assert out.shape == (CHANNELS, SEQ)

    ref = harmolearn_ref(inp)
    # Spikes are 0/1; allow an infinitesimal mismatch budget for rounding-order
    # differences (VPU reduction vs. reference matmul) right at the threshold.
    mismatch = float(jnp.mean(jnp.abs(out - ref) > 1e-3))
    assert mismatch < 0.005, f"mismatch fraction {mismatch}"

    # TODO(synk): the kwargs path returning (out, w_rec, h_rec) with the w_range
    # clip is not emitted; only the default forward output is produced.
    print("KERNEL_OK")
</pallas_src>

<mosaic_0001>
module attributes {stable_mosaic.version = 11 : i64} {
  func.func @_harmolearn_kernel(%arg0: i32, %arg1: memref<48x128xf32, #tpu.memory_space<vmem>>, %arg2: memref<48x128xf32, #tpu.memory_space<vmem>>, %arg3: memref<32x128xf32, #tpu.memory_space<vmem>>) attributes {dimension_semantics = [#tpu.dimension_semantics<arbitrary>], iteration_bounds = array<i64: 1>, scalar_prefetch = 0 : i64, scratch_operands = 1 : i64, tpu.core_type = #tpu.core_type<tc>, window_params = [{pipeline_mode = #tpu.pipeline_mode<synchronous>, transform_indices = @transform_0, window_bounds = array<i64: 48, 128>}, {pipeline_mode = #tpu.pipeline_mode<synchronous>, transform_indices = @transform_1, window_bounds = array<i64: 48, 128>}]} {
    %c0 = arith.constant 0 : index
    %c0_0 = arith.constant 0 : index
    %0 = vector.load %arg1[%c0, %c0_0] : memref<48x128xf32, #tpu.memory_space<vmem>>, vector<16x128xf32>
    %c0_1 = arith.constant 0 : index
    %c0_2 = arith.constant 0 : index
    %1 = vector.load %arg2[%c0_1, %c0_2] : memref<48x128xf32, #tpu.memory_space<vmem>>, vector<16x128xf32>
    tpu.vector_store %arg2[%c0_1, %c0_2], %0 {strides = array<i32>} : memref<48x128xf32, #tpu.memory_space<vmem>>, vector<16x128xf32>,
    %c0_3 = arith.constant 0 : index
    %c0_4 = arith.constant 0 : index
    %2 = vector.load %arg1[%c0_3, %c0_4] : memref<48x128xf32, #tpu.memory_space<vmem>>, vector<48x128xf32>
    %cst = arith.constant dense<0.000000e+00> : vector<48xf32>
    %3 = vector.multi_reduction <add>, %2, %cst [1] : vector<48x128xf32> to vector<48xf32>
    %4 = vector.shape_cast %3 : vector<48xf32> to vector<48x1xf32>
    %5 = vector.broadcast %4 : vector<48x1xf32> to vector<48x128xf32>
    %6 = arith.mulf %2, %5 : vector<48x128xf32>
    %7 = vector.extract_strided_slice %6 {offsets = [0, 0], sizes = [47, 128], strides = [1, 1]} : vector<48x128xf32> to vector<47x128xf32>
    %8 = vector.extract_strided_slice %6 {offsets = [1, 0], sizes = [47, 128], strides = [1, 1]} : vector<48x128xf32> to vector<47x128xf32>
    %9 = arith.addf %7, %8 : vector<47x128xf32>
    %10 = vector.extract_strided_slice %9 {offsets = [0, 0], sizes = [45, 128], strides = [1, 1]} : vector<47x128xf32> to vector<45x128xf32>
    %11 = vector.extract_strided_slice %9 {offsets = [2, 0], sizes = [45, 128], strides = [1, 1]} : vector<47x128xf32> to vector<45x128xf32>
    %12 = arith.addf %10, %11 : vector<45x128xf32>
    %13 = vector.extract_strided_slice %12 {offsets = [0, 0], sizes = [41, 128], strides = [1, 1]} : vector<45x128xf32> to vector<41x128xf32>
    %14 = vector.extract_strided_slice %12 {offsets = [4, 0], sizes = [41, 128], strides = [1, 1]} : vector<45x128xf32> to vector<41x128xf32>
    %15 = arith.addf %13, %14 : vector<41x128xf32>
    %16 = vector.extract_strided_slice %15 {offsets = [0, 0], sizes = [33, 128], strides = [1, 1]} : vector<41x128xf32> to vector<33x128xf32>
    %17 = vector.extract_strided_slice %15 {offsets = [8, 0], sizes = [33, 128], strides = [1, 1]} : vector<41x128xf32> to vector<33x128xf32>
    %18 = arith.addf %16, %17 : vector<33x128xf32>
    %19 = vector.extract_strided_slice %18 {offsets = [0, 0], sizes = [32, 128], strides = [1, 1]} : vector<33x128xf32> to vector<32x128xf32>
    %20 = tpu.iota {dimensions = array<i32: 1>} : vector<32x128xi32>
    %c32_i32 = arith.constant 32 : i32
    %21 = vector.broadcast %c32_i32 : i32 to vector<32x128xi32>
    %22 = arith.cmpi slt, %20, %21 : vector<32x128xi32>
    %cst_5 = arith.constant -3.40282347E+38 : f32
    %23 = vector.broadcast %cst_5 : f32 to vector<32x128xf32>
    %24 = arith.select %22, %19, %23 : vector<32x128xi1>, vector<32x128xf32>
    %cst_6 = arith.constant dense<0xFF800000> : vector<32xf32>
    %25 = vector.multi_reduction <maximumf>, %24, %cst_6 [1] : vector<32x128xf32> to vector<32xf32>
    %26 = vector.shape_cast %25 : vector<32xf32> to vector<32x1xf32>
    %cst_7 = arith.constant 9.99999974E-6 : f32
    %27 = vector.broadcast %cst_7 : f32 to vector<32x1xf32>
    %28 = arith.addf %27, %26 : vector<32x1xf32>
    %29 = tpu.reciprocal %28 : vector<32x1xf32> -> vector<32x1xf32>
    %30 = vector.broadcast %29 : vector<32x1xf32> to vector<32x128xf32>
    %31 = arith.mulf %19, %30 : vector<32x128xf32>
    %c0_8 = arith.constant 0 : index
    %c0_9 = arith.constant 0 : index
    %32 = vector.load %arg3[%c0_8, %c0_9] : memref<32x128xf32, #tpu.memory_space<vmem>>, vector<32x128xf32>
    tpu.vector_store %arg3[%c0_8, %c0_9], %31 {strides = array<i32>} : memref<32x128xf32, #tpu.memory_space<vmem>>, vector<32x128xf32>,
    %cst_10 = arith.constant 1.000000e+00 : f32
    %33 = vector.broadcast %cst_10 : f32 to vector<1x128xf32>
    %cst_11 = arith.constant 0.000000e+00 : f32
    %34 = vector.broadcast %cst_11 : f32 to vector<1x128xf32>
    %c0_i32 = arith.constant 0 : i32
    %c4_i32 = arith.constant 4 : i32
    %35 = arith.addi %c0_i32, %c4_i32 : i32
    %c1_i32 = arith.constant 1 : i32
    %36:2 = scf.for %arg4 = %c0_i32 to %35 step %c1_i32 iter_args(%arg5 = %33, %arg6 = %34) -> (vector<1x128xf32>, vector<1x128xf32>)  : i32 {
      %c8_i32 = arith.constant 8 : i32
      %37 = arith.muli %arg4, %c8_i32 : i32
      %38 = tpu.assume_multiple %37, 8 : i32
      %39 = arith.index_cast %38 : i32 to index
      %c0_13 = arith.constant 0 : index
      %40 = vector.load %arg3[%39, %c0_13] : memref<32x128xf32, #tpu.memory_space<vmem>>, vector<8x128xf32>
      %c16_i32 = arith.constant 16 : i32
      %41 = arith.addi %c16_i32, %38 : i32
      %42 = arith.index_cast %41 : i32 to index
      %c0_14 = arith.constant 0 : index
      %43 = vector.load %arg1[%42, %c0_14] : memref<48x128xf32, #tpu.memory_space<vmem>>, vector<8x128xf32>
      %cst_15 = arith.constant 5.000000e-01 : f32
      %44 = vector.broadcast %cst_15 : f32 to vector<1x128xf32>
      %45 = arith.mulf %44, %arg5 : vector<1x128xf32>
      %46 = vector.extract_strided_slice %40 {offsets = [0, 0], sizes = [1, 128], strides = [1, 1]} : vector<8x128xf32> to vector<1x128xf32>
      %cst_16 = arith.constant 5.000000e-01 : f32
      %47 = vector.broadcast %cst_16 : f32 to vector<1x128xf32>
      %48 = arith.mulf %47, %46 : vector<1x128xf32>
      %49 = arith.addf %45, %48 : vector<1x128xf32>
      %50 = vector.extract_strided_slice %43 {offsets = [0, 0], sizes = [1, 128], strides = [1, 1]} : vector<8x128xf32> to vector<1x128xf32>
      %51 = arith.mulf %49, %50 : vector<1x128xf32>
      %cst_17 = arith.constant 1.000000e+00 : f32
      %52 = vector.broadcast %cst_17 : f32 to vector<1x128xf32>
      %53 = arith.cmpf ogt, %arg6, %52 : vector<1x128xf32>
      %54 = arith.extui %53 : vector<1x128xi1> to vector<1x128xi32>
      %55 = arith.sitofp %54 : vector<1x128xi32> to vector<1x128xf32>
      %cst_18 = arith.constant 0.949999988 : f32
      %56 = vector.broadcast %cst_18 : f32 to vector<1x128xf32>
      %57 = arith.mulf %56, %arg6 : vector<1x128xf32>
      %58 = arith.addf %57, %51 : vector<1x128xf32>
      %cst_19 = arith.constant 1.000000e+00 : f32
      %59 = vector.broadcast %cst_19 : f32 to vector<1x128xf32>
      %60 = arith.mulf %55, %59 : vector<1x128xf32>
      %61 = arith.subf %58, %60 : vector<1x128xf32>
      %cst_20 = arith.constant 1.000000e+00 : f32
      %62 = vector.broadcast %cst_20 : f32 to vector<1x128xf32>
      %63 = arith.cmpf ogt, %61, %62 : vector<1x128xf32>
      %64 = arith.extui %63 : vector<1x128xi1> to vector<1x128xi32>
      %65 = arith.sitofp %64 : vector<1x128xi32> to vector<1x128xf32>
      %cst_21 = arith.constant 5.000000e-01 : f32
      %66 = vector.broadcast %cst_21 : f32 to vector<1x128xf32>
      %67 = arith.mulf %66, %49 : vector<1x128xf32>
      %68 = vector.extract_strided_slice %40 {offsets = [1, 0], sizes = [1, 128], strides = [1, 1]} : vector<8x128xf32> to vector<1x128xf32>
      %cst_22 = arith.constant 5.000000e-01 : f32
      %69 = vector.broadcast %cst_22 : f32 to vector<1x128xf32>
      %70 = arith.mulf %69, %68 : vector<1x128xf32>
      %71 = arith.addf %67, %70 : vector<1x128xf32>
      %72 = vector.extract_strided_slice %43 {offsets = [1, 0], sizes = [1, 128], strides = [1, 1]} : vector<8x128xf32> to vector<1x128xf32>
      %73 = arith.mulf %71, %72 : vector<1x128xf32>
      %cst_23 = arith.constant 1.000000e+00 : f32
      %74 = vector.broadcast %cst_23 : f32 to vector<1x128xf32>
      %75 = arith.cmpf ogt, %61, %74 : vector<1x128xf32>
      %76 = arith.extui %75 : vector<1x128xi1> to vector<1x128xi32>
      %77 = arith.sitofp %76 : vector<1x128xi32> to vector<1x128xf32>
      %cst_24 = arith.constant 0.949999988 : f32
      %78 = vector.broadcast %cst_24 : f32 to vector<1x128xf32>
      %79 = arith.mulf %78, %61 : vector<1x128xf32>
      %80 = arith.addf %79, %73 : vector<1x128xf32>
      %cst_25 = arith.constant 1.000000e+00 : f32
      %81 = vector.broadcast %cst_25 : f32 to vector<1x128xf32>
      %82 = arith.mulf %77, %81 : vector<1x128xf32>
      %83 = arith.subf %80, %82 : vector<1x128xf32>
      %cst_26 = arith.constant 1.000000e+00 : f32
      %84 = vector.broadcast %cst_26 : f32 to vector<1x128xf32>
      %85 = arith.cmpf ogt, %83, %84 : vector<1x128xf32>
      %86 = arith.extui %85 : vector<1x128xi1> to vector<1x128xi32>
      %87 = arith.sitofp %86 : vector<1x128xi32> to vector<1x128xf32>
      %cst_27 = arith.constant 5.000000e-01 : f32
      %88 = vector.broadcast %cst_27 : f32 to vector<1x128xf32>
      %89 = arith.mulf %88, %71 : vector<1x128xf32>
      %90 = vector.extract_strided_slice %40 {offsets = [2, 0], sizes = [1, 128], strides = [1, 1]} : vector<8x128xf32> to vector<1x128xf32>
      %cst_28 = arith.constant 5.000000e-01 : f32
      %91 = vector.broadcast %cst_28 : f32 to vector<1x128xf32>
      %92 = arith.mulf %91, %90 : vector<1x128xf32>
      %93 = arith.addf %89, %92 : vector<1x128xf32>
      %94 = vector.extract_strided_slice %43 {offsets = [2, 0], sizes = [1, 128], strides = [1, 1]} : vector<8x128xf32> to vector<1x128xf32>
      %95 = arith.mulf %93, %94 : vector<1x128xf32>
      %cst_29 = arith.constant 1.000000e+00 : f32
      %96 = vector.broadcast %cst_29 : f32 to vector<1x128xf32>
      %97 = arith.cmpf ogt, %83, %96 : vector<1x128xf32>
      %98 = arith.extui %97 : vector<1x128xi1> to vector<1x128xi32>
      %99 = arith.sitofp %98 : vector<1x128xi32> to vector<1x128xf32>
      %cst_30 = arith.constant 0.949999988 : f32
      %100 = vector.broadcast %cst_30 : f32 to vector<1x128xf32>
      %101 = arith.mulf %100, %83 : vector<1x128xf32>
      %102 = arith.addf %101, %95 : vector<1x128xf32>
      %cst_31 = arith.constant 1.000000e+00 : f32
      %103 = vector.broadcast %cst_31 : f32 to vector<1x128xf32>
      %104 = arith.mulf %99, %103 : vector<1x128xf32>
      %105 = arith.subf %102, %104 : vector<1x128xf32>
      %cst_32 = arith.constant 1.000000e+00 : f32
      %106 = vector.broadcast %cst_32 : f32 to vector<1x128xf32>
      %107 = arith.cmpf ogt, %105, %106 : vector<1x128xf32>
      %108 = arith.extui %107 : vector<1x128xi1> to vector<1x128xi32>
      %109 = arith.sitofp %108 : vector<1x128xi32> to vector<1x128xf32>
      %cst_33 = arith.constant 5.000000e-01 : f32
      %110 = vector.broadcast %cst_33 : f32 to vector<1x128xf32>
      %111 = arith.mulf %110, %93 : vector<1x128xf32>
      %112 = vector.extract_strided_slice %40 {offsets = [3, 0], sizes = [1, 128], strides = [1, 1]} : vector<8x128xf32> to vector<1x128xf32>
      %cst_34 = arith.constant 5.000000e-01 : f32
      %113 = vector.broadcast %cst_34 : f32 to vector<1x128xf32>
      %114 = arith.mulf %113, %112 : vector<1x128xf32>
      %115 = arith.addf %111, %114 : vector<1x128xf32>
      %116 = vector.extract_strided_slice %43 {offsets = [3, 0], sizes = [1, 128], strides = [1, 1]} : vector<8x128xf32> to vector<1x128xf32>
      %117 = arith.mulf %115, %116 : vector<1x128xf32>
      %cst_35 = arith.constant 1.000000e+00 : f32
      %118 = vector.broadcast %cst_35 : f32 to vector<1x128xf32>
      %119 = arith.cmpf ogt, %105, %118 : vector<1x128xf32>
      %120 = arith.extui %119 : vector<1x128xi1> to vector<1x128xi32>
      %121 = arith.sitofp %120 : vector<1x128xi32> to vector<1x128xf32>
      %cst_36 = arith.constant 0.949999988 : f32
      %122 = vector.broadcast %cst_36 : f32 to vector<1x128xf32>
      %123 = arith.mulf %122, %105 : vector<1x128xf32>
      %124 = arith.addf %123, %117 : vector<1x128xf32>
      %cst_37 = arith.constant 1.000000e+00 : f32
      %125 = vector.broadcast %cst_37 : f32 to vector<1x128xf32>
      %126 = arith.mulf %121, %125 : vector<1x128xf32>
      %127 = arith.subf %124, %126 : vector<1x128xf32>
      %cst_38 = arith.constant 1.000000e+00 : f32
      %128 = vector.broadcast %cst_38 : f32 to vector<1x128xf32>
      %129 = arith.cmpf ogt, %127, %128 : vector<1x128xf32>
      %130 = arith.extui %129 : vector<1x128xi1> to vector<1x128xi32>
      %131 = arith.sitofp %130 : vector<1x128xi32> to vector<1x128xf32>
      %cst_39 = arith.constant 5.000000e-01 : f32
      %132 = vector.broadcast %cst_39 : f32 to vector<1x128xf32>
      %133 = arith.mulf %132, %115 : vector<1x128xf32>
      %134 = vector.extract_strided_slice %40 {offsets = [4, 0], sizes = [1, 128], strides = [1, 1]} : vector<8x128xf32> to vector<1x128xf32>
      %cst_40 = arith.constant 5.000000e-01 : f32
      %135 = vector.broadcast %cst_40 : f32 to vector<1x128xf32>
      %136 = arith.mulf %135, %134 : vector<1x128xf32>
      %137 = arith.addf %133, %136 : vector<1x128xf32>
      %138 = vector.extract_strided_slice %43 {offsets = [4, 0], sizes = [1, 128], strides = [1, 1]} : vector<8x128xf32> to vector<1x128xf32>
      %139 = arith.mulf %137, %138 : vector<1x128xf32>
      %cst_41 = arith.constant 1.000000e+00 : f32
      %140 = vector.broadcast %cst_41 : f32 to vector<1x128xf32>
      %141 = arith.cmpf ogt, %127, %140 : vector<1x128xf32>
      %142 = arith.extui %141 : vector<1x128xi1> to vector<1x128xi32>
      %143 = arith.sitofp %142 : vector<1x128xi32> to vector<1x128xf32>
      %cst_42 = arith.constant 0.949999988 : f32
      %144 = vector.broadcast %cst_42 : f32 to vector<1x128xf32>
      %145 = arith.mulf %144, %127 : vector<1x128xf32>
      %146 = arith.addf %145, %139 : vector<1x128xf32>
      %cst_43 = arith.constant 1.000000e+00 : f32
      %147 = vector.broadcast %cst_43 : f32 to vector<1x128xf32>
      %148 = arith.mulf %143, %147 : vector<1x128xf32>
      %149 = arith.subf %146, %148 : vector<1x128xf32>
      %cst_44 = arith.constant 1.000000e+00 : f32
      %150 = vector.broadcast %cst_44 : f32 to vector<1x128xf32>
      %151 = arith.cmpf ogt, %149, %150 : vector<1x128xf32>
      %152 = arith.extui %151 : vector<1x128xi1> to vector<1x128xi32>
      %153 = arith.sitofp %152 : vector<1x128xi32> to vector<1x128xf32>
      %cst_45 = arith.constant 5.000000e-01 : f32
      %154 = vector.broadcast %cst_45 : f32 to vector<1x128xf32>
      %155 = arith.mulf %154, %137 : vector<1x128xf32>
      %156 = vector.extract_strided_slice %40 {offsets = [5, 0], sizes = [1, 128], strides = [1, 1]} : vector<8x128xf32> to vector<1x128xf32>
      %cst_46 = arith.constant 5.000000e-01 : f32
      %157 = vector.broadcast %cst_46 : f32 to vector<1x128xf32>
      %158 = arith.mulf %157, %156 : vector<1x128xf32>
      %159 = arith.addf %155, %158 : vector<1x128xf32>
      %160 = vector.extract_strided_slice %43 {offsets = [5, 0], sizes = [1, 128], strides = [1, 1]} : vector<8x128xf32> to vector<1x128xf32>
      %161 = arith.mulf %159, %160 : vector<1x128xf32>
      %cst_47 = arith.constant 1.000000e+00 : f32
      %162 = vector.broadcast %cst_47 : f32 to vector<1x128xf32>
      %163 = arith.cmpf ogt, %149, %162 : vector<1x128xf32>
      %164 = arith.extui %163 : vector<1x128xi1> to vector<1x128xi32>
      %165 = arith.sitofp %164 : vector<1x128xi32> to vector<1x128xf32>
      %cst_48 = arith.constant 0.949999988 : f32
      %166 = vector.broadcast %cst_48 : f32 to vector<1x128xf32>
      %167 = arith.mulf %166, %149 : vector<1x128xf32>
      %168 = arith.addf %167, %161 : vector<1x128xf32>
      %cst_49 = arith.constant 1.000000e+00 : f32
      %169 = vector.broadcast %cst_49 : f32 to vector<1x128xf32>
      %170 = arith.mulf %165, %169 : vector<1x128xf32>
      %171 = arith.subf %168, %170 : vector<1x128xf32>
      %cst_50 = arith.constant 1.000000e+00 : f32
      %172 = vector.broadcast %cst_50 : f32 to vector<1x128xf32>
      %173 = arith.cmpf ogt, %171, %172 : vector<1x128xf32>
      %174 = arith.extui %173 : vector<1x128xi1> to vector<1x128xi32>
      %175 = arith.sitofp %174 : vector<1x128xi32> to vector<1x128xf32>
      %cst_51 = arith.constant 5.000000e-01 : f32
      %176 = vector.broadcast %cst_51 : f32 to vector<1x128xf32>
      %177 = arith.mulf %176, %159 : vector<1x128xf32>
      %178 = vector.extract_strided_slice %40 {offsets = [6, 0], sizes = [1, 128], strides = [1, 1]} : vector<8x128xf32> to vector<1x128xf32>
      %cst_52 = arith.constant 5.000000e-01 : f32
      %179 = vector.broadcast %cst_52 : f32 to vector<1x128xf32>
      %180 = arith.mulf %179, %178 : vector<1x128xf32>
      %181 = arith.addf %177, %180 : vector<1x128xf32>
      %182 = vector.extract_strided_slice %43 {offsets = [6, 0], sizes = [1, 128], strides = [1, 1]} : vector<8x128xf32> to vector<1x128xf32>
      %183 = arith.mulf %181, %182 : vector<1x128xf32>
      %cst_53 = arith.constant 1.000000e+00 : f32
      %184 = vector.broadcast %cst_53 : f32 to vector<1x128xf32>
      %185 = arith.cmpf ogt, %171, %184 : vector<1x128xf32>
      %186 = arith.extui %185 : vector<1x128xi1> to vector<1x128xi32>
      %187 = arith.sitofp %186 : vector<1x128xi32> to vector<1x128xf32>
      %cst_54 = arith.constant 0.949999988 : f32
      %188 = vector.broadcast %cst_54 : f32 to vector<1x128xf32>
      %189 = arith.mulf %188, %171 : vector<1x128xf32>
      %190 = arith.addf %189, %183 : vector<1x128xf32>
      %cst_55 = arith.constant 1.000000e+00 : f32
      %191 = vector.broadcast %cst_55 : f32 to vector<1x128xf32>
      %192 = arith.mulf %187, %191 : vector<1x128xf32>
      %193 = arith.subf %190, %192 : vector<1x128xf32>
      %cst_56 = arith.constant 1.000000e+00 : f32
      %194 = vector.broadcast %cst_56 : f32 to vector<1x128xf32>
      %195 = arith.cmpf ogt, %193, %194 : vector<1x128xf32>
      %196 = arith.extui %195 : vector<1x128xi1> to vector<1x128xi32>
      %197 = arith.sitofp %196 : vector<1x128xi32> to vector<1x128xf32>
      %cst_57 = arith.constant 5.000000e-01 : f32
      %198 = vector.broadcast %cst_57 : f32 to vector<1x128xf32>
      %199 = arith.mulf %198, %181 : vector<1x128xf32>
      %200 = vector.extract_strided_slice %40 {offsets = [7, 0], sizes = [1, 128], strides = [1, 1]} : vector<8x128xf32> to vector<1x128xf32>
      %cst_58 = arith.constant 5.000000e-01 : f32
      %201 = vector.broadcast %cst_58 : f32 to vector<1x128xf32>
      %202 = arith.mulf %201, %200 : vector<1x128xf32>
      %203 = arith.addf %199, %202 : vector<1x128xf32>
      %204 = vector.extract_strided_slice %43 {offsets = [7, 0], sizes = [1, 128], strides = [1, 1]} : vector<8x128xf32> to vector<1x128xf32>
      %205 = arith.mulf %203, %204 : vector<1x128xf32>
      %cst_59 = arith.constant 1.000000e+00 : f32
      %206 = vector.broadcast %cst_59 : f32 to vector<1x128xf32>
      %207 = arith.cmpf ogt, %193, %206 : vector<1x128xf32>
      %208 = arith.extui %207 : vector<1x128xi1> to vector<1x128xi32>
      %209 = arith.sitofp %208 : vector<1x128xi32> to vector<1x128xf32>
      %cst_60 = arith.constant 0.949999988 : f32
      %210 = vector.broadcast %cst_60 : f32 to vector<1x128xf32>
      %211 = arith.mulf %210, %193 : vector<1x128xf32>
      %212 = arith.addf %211, %205 : vector<1x128xf32>
      %cst_61 = arith.constant 1.000000e+00 : f32
      %213 = vector.broadcast %cst_61 : f32 to vector<1x128xf32>
      %214 = arith.mulf %209, %213 : vector<1x128xf32>
      %215 = arith.subf %212, %214 : vector<1x128xf32>
      %cst_62 = arith.constant 1.000000e+00 : f32
      %216 = vector.broadcast %cst_62 : f32 to vector<1x128xf32>
      %217 = arith.cmpf ogt, %215, %216 : vector<1x128xf32>
      %218 = arith.extui %217 : vector<1x128xi1> to vector<1x128xi32>
      %219 = arith.sitofp %218 : vector<1x128xi32> to vector<1x128xf32>
      %220 = tpu.concatenate %65, %87, %109, %131, %153, %175, %197, %219 in 0 : vector<1x128xf32>, vector<1x128xf32>, vector<1x128xf32>, vector<1x128xf32>, vector<1x128xf32>, vector<1x128xf32>, vector<1x128xf32>, vector<1x128xf32> -> vector<8x128xf32>
      %c16_i32_63 = arith.constant 16 : i32
      %221 = arith.addi %c16_i32_63, %38 : i32
      %222 = arith.index_cast %221 : i32 to index
      %c0_64 = arith.constant 0 : index
      %223 = vector.load %arg2[%222, %c0_64] : memref<48x128xf32, #tpu.memory_space<vmem>>, vector<8x128xf32>
      tpu.vector_store %arg2[%222, %c0_64], %220 {strides = array<i32>} : memref<48x128xf32, #tpu.memory_space<vmem>>, vector<8x128xf32>,
      scf.yield %203, %215 : vector<1x128xf32>, vector<1x128xf32>
    }
    %c4_i32_12 = arith.constant 4 : i32
    return
  }
  func.func @transform_0(%arg0: i32) -> (i32, i32) {
    %c0_i32 = arith.constant 0 : i32
    %c0_i32_0 = arith.constant 0 : i32
    %c0_i32_1 = arith.constant 0 : i32
    return %c0_i32, %c0_i32_0 : i32, i32
  }
  func.func @transform_1(%arg0: i32) -> (i32, i32) {
    %c0_i32 = arith.constant 0 : i32
    %c0_i32_0 = arith.constant 0 : i32
    %c0_i32_1 = arith.constant 0 : i32
    return %c0_i32, %c0_i32_0 : i32, i32
  }
}

</mosaic_0001>

<bundles_post_ra>
// kernel: tpu_custom_call.1
= control target key start
LH: loop header
LB: loop body
LE: loop exit
PB: predicated region body
PF: predicated region fallthrough
CT: control target
= control target key end

     0   :  { %6 = vsyncpa [#allocation4], 0  ;;  %s603_s0 = inlined_call_operand.hbm [shape: f32[48,128], index: 0, kind: input, shape index: {}]   ;;  %s604_s1 = inlined_call_operand.hbm [shape: f32[48,128], index: 1, kind: output, shape index: {}]  }
   0x1   :  { %7 = vsyncpa [#allocation5], 0  ;;  %s487_s6 = smov [#allocation3]   ;;  %s415_s10 = scalar_lea.hbm %s603_s0, 768 }
   0x2   :  { %s13_s7 = sshll.u32 %s487_s6, 4  ;;  %p416_p0 = scmp.ne.s32.totalorder %s603_s0, %s415_s10  ;;  %s14_s7 = int_to_ptr.vmem [resolvable:$true] %s13_s7 }
   0x3   :  { %p419_p1 = scmp.lt.u32.totalorder %s415_s10, %s603_s0 }
   0x5   :  { %p421_p2 = pnand %p419_p1, %p416_p0 }
   0x7   :  { %424 = shalt.err (!%p421_p2)
}
   0x8   :  { %s425_s15 = scalar_lea.vmem %s14_s7, 768  ;;  %p430_p4 = scmp.lt.s32.totalorder %s14_s7, %s14_s7 }
   0x9   :  { %p426_p3 = scmp.ne.s32.totalorder %s14_s7, %s425_s15  ;;  %p431_p5 = scmp.lt.s32.totalorder %s425_s15, %s425_s15 }
   0xb   :  { %p432_p6 = por %p431_p5, %p430_p4 }
   0xd   :  { %p433_p7 = pnand %p432_p6, %p426_p3 }
   0xf   :  { %436 = shalt.err (!%p433_p7)
}
  0x10   :  { %s488_s16 = smov 128   ;;  %s489_s17 = smov 8  }
  0x11   :  { %19 = dma.hbm_to_vmem [thread:$0]  %s603_s0, 768, %s14_s7, [#allocation4], %s488_s16, %s488_s16, %s489_s17  }
  0x12   :  { %471 = dma.done.wait [#allocation4], 768  }
  0x13   :  { %472 = vsyncadd [#allocation4], 4294966528  ;;  %v23_v0 = vld [vmem:[#allocation3] sm:$0xff]  ;;  %v24_v1 = vld [vmem:[#allocation3 + $0x8] sm:$0xff]  ;;  %vm57_vm0 = vcmask 1046528   ;;  %vm87_vm1 = vcmask 1045504   ;;  %v143_v46 = vlaneseq }
  0x14   :  { %v29_v2 = vld [vmem:[#allocation3 + $0x10] sm:$0xff]  ;;  %25 = vst [vmem:[#allocation6] sm:$0xff] %v23_v0  ;;  %26 = vst [vmem:[#allocation6 + $0x8] sm:$0xff] %v24_v1  ;;  %33 = vadd.xlane.f32.xlu0 %v23_v0  ;;  %v30_v3 = vld [vmem:[#allocation3 + $0x18] sm:$0xff]  ;;  %vm117_vm2 = vcmask 1043456   ;;  %s536_s0 = smov 0  }
  0x15   :  { %37 = vadd.xlane.f32.xlu1 %v29_v2  ;;  %v32_v4 = vld [vmem:[#allocation3 + $0x28] sm:$0xff]  ;;  %v31_v5 = vld [vmem:[#allocation3 + $0x20] sm:$0xff]  ;;  %v144_v56 = vand.u32 127, %v143_v46 }
  0x17   :  { %vm145_vm3 = vcmp.lt.s32.totalorder %v144_v56, 32 }
  0x18   :  { %35 = vadd.xlane.f32.xlu0 %v24_v1 }
  0x19   :  { %39 = vadd.xlane.f32.xlu1 %v30_v3 }
  0x1c   :  { %41 = vadd.xlane.f32.xlu0 %v31_v5 }
  0x1d   :  { %43 = vadd.xlane.f32.xlu1 %v32_v4 }
  0xa1   :  { %v34_v7 = vpop.xlane.xlu0 %33 }
  0xa2   :  { %v38_v6 = vpop.xlane.xlu1 %37  ;;  %v45_v9 = vmul.f32 %v34_v7, %v23_v0 }
  0xa3   :  { %v47_v8 = vmul.f32 %v38_v6, %v29_v2 }
  0xa4   :  { %v58_v15 = vrot.slane %v45_v9, 1 }
  0xa5   :  { %v36_v11 = vpop.xlane.xlu0 %35  ;;  %v61_v14 = vrot.slane %v47_v8, 1 }
  0xa6   :  { %v40_v10 = vpop.xlane.xlu1 %39  ;;  %v46_v13 = vmul.f32 %v36_v11, %v24_v1 }
  0xa7   :  { %v48_v12 = vmul.f32 %v40_v10, %v30_v3 }
  0xa8   :  { %v59_v17 = vrot.slane %v46_v13, 1 }
  0xa9   :  { %v63_v16 = vrot.slane %v48_v12, 1  ;;  %v42_v19 = vpop.xlane.xlu0 %41 }
  0xaa   :  { %v44_v18 = vpop.xlane.xlu1 %43  ;;  %v60_v21 = vsel %vm57_vm0, %v58_v15, %v59_v17  ;;  %v62_v22 = vsel %vm57_vm0, %v59_v17, %v61_v14  ;;  %v49_v27 = vmul.f32 %v42_v19, %v31_v5 }
  0xab   :  { %v64_v20 = vsel %vm57_vm0, %v61_v14, %v63_v16  ;;  %v50_v23 = vmul.f32 %v44_v18, %v32_v4  ;;  %v75_v25 = vadd.f32 %v60_v21, %v45_v9  ;;  %v76_v26 = vadd.f32 %v62_v22, %v46_v13 }
  0xac   :  { %v77_v24 = vadd.f32 %v64_v20, %v47_v8  ;;  %v65_v32 = vrot.slane %v49_v27, 1 }
  0xad   :  { %v67_v28 = vrot.slane %v50_v23, 1  ;;  %v88_v30 = vrot.slane %v75_v25, 2  ;;  %v89_v31 = vrot.slane %v76_v26, 2 }
  0xae   :  { %v91_v29 = vrot.slane %v77_v24, 2  ;;  %v66_v35 = vsel %vm57_vm0, %v63_v16, %v65_v32 }
  0xaf   :  { %v80_v33 = vadd.f32 %v67_v28, %v50_v23  ;;  %v68_v36 = vsel %vm57_vm0, %v65_v32, %v67_v28  ;;  %v90_v37 = vsel %vm87_vm1, %v88_v30, %v89_v31  ;;  %v78_v40 = vadd.f32 %v66_v35, %v48_v12 }
  0xb0   :  { %v92_v34 = vsel %vm87_vm1, %v89_v31, %v91_v29  ;;  %v79_v41 = vadd.f32 %v68_v36, %v49_v27  ;;  %v105_v42 = vadd.f32 %v90_v37, %v75_v25  ;;  %v532_v30 = vmov 0.0  }
  0xb1   :  { %v106_v38 = vadd.f32 %v92_v34, %v76_v26  ;;  %v97_v39 = vrot.slane %v80_v33, 2  ;;  %v93_v44 = vrot.slane %v78_v40, 2  ;;  %v534_v31 = vmov 1.0  }
  0xb2   :  { %v95_v45 = vrot.slane %v79_v41, 2  ;;  %v118_v48 = vrot.slane %v105_v42, 4 }
  0xb3   :  { %v119_v43 = vrot.slane %v106_v38, 4  ;;  %v110_v47 = vadd.f32 %v97_v39, %v80_v33  ;;  %v94_v51 = vsel %vm87_vm1, %v91_v29, %v93_v44 }
  0xb4   :  { %v96_v49 = vsel %vm87_vm1, %v93_v44, %v95_v45  ;;  %v98_v50 = vsel %vm87_vm1, %v95_v45, %v97_v39  ;;  %v107_v54 = vadd.f32 %v94_v51, %v77_v24 }
  0xb5   :  { %v108_v52 = vadd.f32 %v96_v49, %v78_v40  ;;  %v109_v53 = vadd.f32 %v98_v50, %v79_v41  ;;  %v120_v55 = vsel %vm117_vm2, %v118_v48, %v119_v43  ;;  %v127_v57 = vrot.slane %v110_v47, 4 }
  0xb6   :  { %v121_v59 = vrot.slane %v107_v54, 4  ;;  %v134_v61 = vadd.f32 %v120_v55, %v105_v42 }
  0xb7   :  { %v125_v58 = vrot.slane %v109_v53, 4  ;;  %v123_v60 = vrot.slane %v108_v52, 4 }
  0xb8   :  { %v122_v62 = vsel %vm117_vm2, %v119_v43, %v121_v59 }
  0xb9   :  { %v124_v63 = vsel %vm117_vm2, %v121_v59, %v123_v60  ;;  %v126_v0 = vsel %vm117_vm2, %v123_v60, %v125_v58  ;;  %v128_v1 = vsel %vm117_vm2, %v125_v58, %v127_v57  ;;  %v135_v2 = vadd.f32 %v122_v62, %v106_v38 }
  0xba   :  { %v136_v3 = vadd.f32 %v124_v63, %v107_v54  ;;  %v137_v4 = vadd.f32 %v126_v0, %v108_v52  ;;  %v138_v5 = vadd.f32 %v128_v1, %v109_v53 }
  0xbb   :  { %v139_v7 = vadd.f32 %v135_v2, %v134_v61 }
  0xbc   :  { %v140_v6 = vadd.f32 %v136_v3, %v135_v2  ;;  %v142_v10 = vadd.f32 %v138_v5, %v137_v4  ;;  %v141_v11 = vadd.f32 %v137_v4, %v136_v3 }
  0xbd   :  { %v146_v9 = vsel %vm145_vm3, %v139_v7, -3.4028235e+38 }
  0xbe   :  { %v147_v8 = vsel %vm145_vm3, %v140_v6, -3.4028235e+38  ;;  %150 = vmax.xlane.f32.xlu0 %v146_v9  ;;  %v149_v12 = vsel %vm145_vm3, %v142_v10, -3.4028235e+38  ;;  %v148_v13 = vsel %vm145_vm3, %v141_v11, -3.4028235e+38 }
  0xbf   :  { %152 = vmax.xlane.f32.xlu1 %v147_v8 }
  0xc2   :  { %154 = vmax.xlane.f32.xlu0 %v148_v13 }
  0xc3   :  { %156 = vmax.xlane.f32.xlu1 %v149_v12 }
 0x14b   :  { %v151_v15 = vpop.xlane.xlu0 %150 }
 0x14c   :  { %v153_v14 = vpop.xlane.xlu1 %152  ;;  %v158_v17 = vadd.f32 1e-05, %v151_v15 }
 0x14d   :  { %v159_v16 = vadd.f32 1e-05, %v153_v14 }
 0x14f   :  { %407 = vrcp.f32 %v159_v16  ;;  %v155_v19 = vpop.xlane.xlu0 %154 }
 0x150   :  { %409 = vrcp.f32 %v158_v17  ;;  %v157_v18 = vpop.xlane.xlu1 %156  ;;  %v160_v21 = vadd.f32 1e-05, %v155_v19 }
 0x151   :  { %v161_v20 = vadd.f32 1e-05, %v157_v18 }
 0x153   :  { %411 = vrcp.f32 %v161_v20 }
 0x154   :  { %413 = vrcp.f32 %v160_v21 }
 0x159   :  { %v408_v22 = vpop.eup %407 }
 0x15a   :  { %v410_v23 = vpop.eup %409  ;;  %v167_v24 = vmul.f32 %v408_v22, %v140_v6 }
 0x15b   :  { %v166_v25 = vmul.f32 %v410_v23, %v139_v7 }
 0x15c   :  { %171 = vst [vmem:[#allocation2 + $0x8] sm:$0xff] %v167_v24 }
 0x15d   :  { %v412_v26 = vpop.eup %411  ;;  %170 = vst [vmem:[#allocation2] sm:$0xff] %v166_v25 }
 0x15e   :  { %v414_v27 = vpop.eup %413  ;;  %v169_v28 = vmul.f32 %v412_v26, %v142_v10 }
 0x15f   :  { %v168_v29 = vmul.f32 %v414_v27, %v141_v11 }
 0x160   :  { %173 = vst [vmem:[#allocation2 + $0x18] sm:$0xff] %v169_v28 }
 0x161   :  { %172 = vst [vmem:[#allocation2 + $0x10] sm:$0xff] %v168_v29 }
 0x162 LB: > { %s544_s20 = sshll.u32 %s485_s0, 3  ;;  %v188_v32 = vmul.f32 0.5, %v481_v31  ;;  %vm192_vm4 = vcmp.gt.f32.partialorder %v477_v30, 1.0  ;;  %v195_v37 = vmul.f32 0.95, %v477_v30  ;;  %v490_v42 = vmov 0.0   ;;  %s485_s0 = sphi %s536_s0, %s179_s0   ;;  %v481_v31 = vphi %v534_v31, %v284_v31   ;;  %v477_v30 = vphi %v532_v30, %v290_v30  }
 0x163   : > { %s183_s21 = scalar_lea.vmem [#allocation2], %s544_s20  ;;  %s348_s22 = scalar_lea.vmem [#allocation3], %s544_s20  ;;  %v367_v43 = vsel %vm192_vm4, 1.0, %v490_v42  ;;  %vm315_vm10 = vcmask 1040384   ;;  %vm317_vm11 = vcmask 1041408   ;;  %vm319_vm13 = vcmask 1042432  }
 0x164   : > { %v550_v35 = vld [vmem:[%s348_s22 + $0x10] sm:$0xff]  ;;  %vm322_vm15 = vcmask 1044480   ;;  %s351_s23 = scalar_lea.vmem [#allocation6], %s544_s20  ;;  %s179_s0 = sadd.s32 1, %s485_s0  }
 0x165   : > { %v207_v41 = vrot.slane %v550_v35, 1  ;;  %v220_v52 = vrot.slane %v550_v35, 2  ;;  %v233_v61 = vrot.slane %v550_v35, 3  ;;  %v246_v6 = vrot.slane %v550_v35, 4  ;;  %p176_p8 = scmp.ge.s32.totalorder %s179_s0, 4  }
 0x166   : > { %v259_v15 = vrot.slane %v550_v35, 5  ;;  %v272_v22 = vrot.slane %v550_v35, 6  ;;  %s491_s24 = smov (%p176_p8), [#allocation6]  }
 0x167   :  { %s333_s25 = sshll.u32 (%p176_p8), %s491_s24, 4  ;;  %s334_s25 = int_to_ptr.vmem [resolvable:$true] %s333_s25 }
 0x168   : > { %v184_v33 = vld [vmem:[%s183_s21] sm:$0xff]  ;;  %s437_s26 = scalar_lea.vmem (%p176_p8), %s334_s25, 768  ;;  %p442_p10 = scmp.lt.s32.totalorder (%p176_p8), %s334_s25, %s334_s25 }
 0x169   : > { %v547_v34 = vmul.f32 0.5, %v184_v33  ;;  %p438_p9 = scmp.ne.s32.totalorder (%p176_p8), %s334_s25, %s437_s26  ;;  %p443_p11 = scmp.lt.s32.totalorder (%p176_p8), %s437_s26, %s437_s26 }
 0x16b   : > { %v190_v36 = vadd.f32 %v547_v34, %v188_v32  ;;  %v203_v38 = vrot.slane %v547_v34, 1  ;;  %v217_v46 = vrot.slane %v547_v34, 2  ;;  %v230_v56 = vrot.slane %v547_v34, 3  ;;  %p444_p12 = por (%p176_p8), %p443_p11, %p442_p10 }
 0x16c   : > { %v243_v1 = vrot.slane %v547_v34, 4  ;;  %v256_v10 = vrot.slane %v547_v34, 5  ;;  %v269_v19 = vrot.slane %v547_v34, 6  ;;  %v282_v29 = vrot.slane %v547_v34, 7 }
 0x16d   : > { %v191_v39 = vmul.f32 %v550_v35, %v190_v36  ;;  %v201_v40 = vmul.f32 0.5, %v190_v36  ;;  %v285_v36 = vrot.slane %v550_v35, 7  ;;  %p445_p13 = pnand (%p176_p8), %p444_p12, %p438_p9 }
 0x16f   : > { %v196_v44 = vadd.f32 %v195_v37, %v191_v39  ;;  %v205_v45 = vadd.f32 %v203_v38, %v201_v40 }
 0x171   : > { %v197_v47 = vsub.f32 %v196_v44, %v367_v43  ;;  %v209_v48 = vmul.f32 %v207_v41, %v205_v45  ;;  %v216_v49 = vmul.f32 0.5, %v205_v45 }
 0x173   : > { %vm198_vm5 = vcmp.gt.f32.partialorder %v197_v47, 1.0  ;;  %v210_v50 = vmul.f32 0.95, %v197_v47  ;;  %v219_v51 = vadd.f32 %v217_v46, %v216_v49 }
 0x174   : > { %v368_v53 = vsel %vm198_vm5, 1.0, %v490_v42 }
 0x175   : > { %v211_v54 = vadd.f32 %v210_v50, %v209_v48  ;;  %v229_v55 = vmul.f32 0.5, %v219_v51  ;;  %v222_v58 = vmul.f32 %v220_v52, %v219_v51 }
 0x177   : > { %v212_v57 = vsub.f32 %v211_v54, %v368_v53  ;;  %v232_v60 = vadd.f32 %v230_v56, %v229_v55 }
 0x179   : > { %vm213_vm6 = vcmp.gt.f32.partialorder %v212_v57, 1.0  ;;  %v223_v59 = vmul.f32 0.95, %v212_v57  ;;  %v242_v0 = vmul.f32 0.5, %v232_v60  ;;  %v235_v3 = vmul.f32 %v233_v61, %v232_v60 }
 0x17a   : > { %v369_v62 = vsel %vm213_vm6, 1.0, %v490_v42 }
 0x17b   : > { %v224_v63 = vadd.f32 %v223_v59, %v222_v58  ;;  %v245_v5 = vadd.f32 %v243_v1, %v242_v0  ;;  %v295_v25 = vrot.slane %v369_v62, 7 }
 0x17d   : > { %v225_v2 = vsub.f32 %v224_v63, %v369_v62  ;;  %v255_v9 = vmul.f32 0.5, %v245_v5  ;;  %v248_v12 = vmul.f32 %v246_v6, %v245_v5  ;;  %v316_v33 = vsel %vm315_vm10, %v368_v53, %v295_v25 }
 0x17f   : > { %vm226_vm7 = vcmp.gt.f32.partialorder %v225_v2, 1.0  ;;  %v236_v4 = vmul.f32 0.95, %v225_v2  ;;  %v258_v14 = vadd.f32 %v256_v10, %v255_v9 }
 0x180   : > { %v370_v7 = vsel %vm226_vm7, 1.0, %v490_v42 }
 0x181   : > { %v237_v8 = vadd.f32 %v236_v4, %v235_v3  ;;  %v268_v18 = vmul.f32 0.5, %v258_v14  ;;  %v261_v21 = vmul.f32 %v259_v15, %v258_v14  ;;  %v298_v30 = vrot.slane %v370_v7, 6 }
 0x183   : > { %v238_v11 = vsub.f32 %v237_v8, %v370_v7  ;;  %v271_v24 = vadd.f32 %v269_v19, %v268_v18  ;;  %v318_v40 = vsel %vm317_vm11, %v316_v33, %v298_v30 }
 0x185   : > { %vm239_vm8 = vcmp.gt.f32.partialorder %v238_v11, 1.0  ;;  %v249_v13 = vmul.f32 0.95, %v238_v11  ;;  %v281_v28 = vmul.f32 0.5, %v271_v24  ;;  %v274_v32 = vmul.f32 %v272_v22, %v271_v24 }
 0x186   : > { %v371_v16 = vsel %vm239_vm8, 1.0, %v490_v42 }
 0x187   : > { %v250_v17 = vadd.f32 %v249_v13, %v248_v12  ;;  %v301_v38 = vrot.slane %v371_v16, 5 }
 0x189   : > { %v251_v20 = vsub.f32 %v250_v17, %v371_v16  ;;  %v320_v34 = vsel %vm319_vm13, %v318_v40, %v301_v38 }
 0x18b   : > { %vm252_vm9 = vcmp.gt.f32.partialorder %v251_v20, 1.0  ;;  %v262_v23 = vmul.f32 0.95, %v251_v20 }
 0x18c   : > { %v372_v26 = vsel %vm252_vm9, 1.0, %v490_v42 }
 0x18d   : > { %v263_v27 = vadd.f32 %v262_v23, %v261_v21  ;;  %v304_v43 = vrot.slane %v372_v26, 4 }
 0x18f   : > { %v264_v31 = vsub.f32 %v263_v27, %v372_v26  ;;  %v321_v35 = vsel %vm117_vm2, %v320_v34, %v304_v43 }
 0x191   : > { %vm265_vm12 = vcmp.gt.f32.partialorder %v264_v31, 1.0  ;;  %v275_v37 = vmul.f32 0.95, %v264_v31  ;;  %v284_v31 = vadd.f32 %v282_v29, %v281_v28  }
 0x192   : > { %v373_v39 = vsel %vm265_vm12, 1.0, %v490_v42 }
 0x193   : > { %v276_v41 = vadd.f32 %v275_v37, %v274_v32  ;;  %v287_v45 = vmul.f32 %v285_v36, %v284_v31  ;;  %v307_v47 = vrot.slane %v373_v39, 3 }
 0x195   : > { %v277_v44 = vsub.f32 %v276_v41, %v373_v39  ;;  %v323_v51 = vsel %vm322_vm15, %v321_v35, %v307_v47 }
 0x197   : > { %vm278_vm14 = vcmp.gt.f32.partialorder %v277_v44, 1.0  ;;  %v288_v46 = vmul.f32 0.95, %v277_v44 }
 0x198   : > { %v374_v48 = vsel %vm278_vm14, 1.0, %v490_v42 }
 0x199   : > { %v289_v49 = vadd.f32 %v288_v46, %v287_v45  ;;  %v310_v50 = vrot.slane %v374_v48, 2 }
 0x19b   : > { %v290_v30 = vsub.f32 %v289_v49, %v374_v48   ;;  %v324_v53 = vsel %vm87_vm1, %v323_v51, %v310_v50 }
 0x19c   :  { %178 = sbr.rel (!%p176_p8) target bundleno = 354 (0x162), region = 38 }
 0x19d   : > { %vm291_vm3 = vcmp.gt.f32.partialorder %v290_v30, 1.0 }
 0x19e   : > { %v375_v52 = vsel %vm291_vm3, 1.0, %v490_v42 }
 0x19f   : > { %v313_v54 = vrot.slane %v375_v52, 1 }
 0x1a1   : > { %v325_v55 = vsel %vm57_vm0, %v324_v53, %v313_v54 }
 0x1a2   : > { %377 = vst [vmem:[%s351_s23 + $0x10] sm:$0xff] %v325_v55 }
 0x1a3   :  { %448 = shalt.err (!%p445_p13)
}
 0x1a4   :  { %s449_s29 = scalar_lea.hbm %s604_s1, 768 }
 0x1a5   :  { %p450_p0 = scmp.ne.s32.totalorder %s604_s1, %s449_s29  ;;  %p453_p1 = scmp.lt.u32.totalorder %s449_s29, %s604_s1 }
 0x1a7   :  { %p455_p2 = pnand %p453_p1, %p450_p0 }
 0x1a9   :  { %458 = shalt.err (!%p455_p2)
}
 0x1aa   :  { %339 = dma.vmem_to_hbm [thread:$0]  %s334_s25, 768, %s604_s1, [#allocation5], %s488_s16, %s488_s16, %s489_s17  }
 0x1ab   :  { %473 = dma.done.wait [#allocation5], 768  }
 0x1ac   :  { %474 = vsyncadd [#allocation5], 4294966528 }
 0x1ad   :  { %343 = vsyncpa [#allocation4], 1 }
 0x1ae   :  { %344 = vsyncpa [#allocation5], 1 }

</bundles_post_ra>
